<compile_context>
chip_gen: v7x
topology: tpu7x:2x2x1
jax: 0.10.0
libtpu: 0.0.40
codegen_flags: <defaults>
</compile_context>

<pallas_src>
import functools

import jax
import jax.numpy as jnp
from jax.experimental import pallas as pl
from jax.experimental.pallas import tpu as pltpu


def _ln_relu_fc(h, gamma_ref, beta_ref, wfc_ref, bfc_ref, out_ref, ln_eps):
    """LayerNorm over the feature (sublane) axis, ReLU, then fc(H -> 1)."""
    mean = jnp.mean(h, axis=0, keepdims=True)
    cen = h - mean
    var = jnp.mean(cen * cen, axis=0, keepdims=True)
    h = cen * jax.lax.rsqrt(var + ln_eps)
    h = h * gamma_ref[...] + beta_ref[...]
    h = jnp.maximum(h, 0.0)                       # dropout(eval)=identity; ReLU
    out_ref[...] = (jnp.sum(h * wfc_ref[...], axis=0, keepdims=True)
                    + bfc_ref[...])               # (1, batch_tile), lane-dense


def _make_kernel(num_layers, hidden_size, ln_eps, matmul_dtype):
    H = hidden_size

    def gate_combine(gates):
        # Rows 0:2H hold 0.5 * pre-activation of [i; o] (scale folded into the
        # weights); rows 2H:3H hold g.  sigmoid(x) = 0.5*tanh(x/2)+0.5 -> one EUP
        # tanh for both sigmoid gates, one tanh for g, one tanh for the cell.
        sig = 0.5 * jnp.tanh(gates[:2 * H, :]) + 0.5
        g = jnp.tanh(gates[2 * H:, :])
        c = sig[:H, :] * g                        # i * g  (+ f*c0 == 0, pruned)
        return sig[H:2 * H, :] * jnp.tanh(c)      # o * tanh(c)

    if num_layers > 1:
        def kernel(xT_ref, wg0_ref, bg0_ref, wgr_ref, bgr_ref,
                   gamma_ref, beta_ref, wfc_ref, bfc_ref, out_ref):
            # Layer 0 (input Linear already fused into wg0/bg0 by the wrapper).
            gates = jnp.dot(wg0_ref[...], xT_ref[...],
                            preferred_element_type=jnp.float32) + bg0_ref[...]
            h = gate_combine(gates)
            for l in range(num_layers - 1):
                gates = jnp.dot(wgr_ref[l], h.astype(matmul_dtype),
                                preferred_element_type=jnp.float32) + bgr_ref[l]
                h = gate_combine(gates)
            _ln_relu_fc(h, gamma_ref, beta_ref, wfc_ref, bfc_ref, out_ref, ln_eps)
    else:
        def kernel(xT_ref, wg0_ref, bg0_ref,
                   gamma_ref, beta_ref, wfc_ref, bfc_ref, out_ref):
            gates = jnp.dot(wg0_ref[...], xT_ref[...],
                            preferred_element_type=jnp.float32) + bg0_ref[...]
            h = gate_combine(gates)
            _ln_relu_fc(h, gamma_ref, beta_ref, wfc_ref, bfc_ref, out_ref, ln_eps)

    return kernel


def _prepare_kernel_params(params, *, hidden_size, num_layers, matmul_dtype):
    """Re-arrange PyTorch-layout parameters into the kernel's feature-major form."""
    H, L = hidden_size, num_layers
    HI = jax.lax.Precision.HIGHEST
    wlin = params["linear.weight"].astype(jnp.float32)           # (H, D_in)
    blin = params["linear.bias"].astype(jnp.float32)             # (H,)
    # PyTorch gate-row order [i; f; g; o] -> kernel order [i; o; g]; f rows are
    # dropped because f_gate * c0 == 0 with zero initial cell state.
    perm = jnp.concatenate([jnp.arange(0, H),                    # i
                            jnp.arange(3 * H, 4 * H),            # o
                            jnp.arange(2 * H, 3 * H)])           # g
    # Fold the x0.5 of the tanh-based sigmoid into the i/o rows.
    row_scale = jnp.concatenate([jnp.full((2 * H,), 0.5, jnp.float32),
                                 jnp.ones((H,), jnp.float32)])
    wgs, bgs = [], []
    for l in range(L):
        w = params["lstm.weight_ih"][l][perm] * row_scale[:, None]        # (3H, H)
        b = (params["lstm.bias_ih"][l]
             + params["lstm.bias_hh"][l])[perm] * row_scale               # W_hh@h0==0
        if l == 0:
            # Fuse nn.Linear(input->hidden):
            #   gates0 = Wg0 @ (Wlin x + blin) + b0 = (Wg0 Wlin) x + (Wg0 blin + b0)
            b = b + jnp.dot(w, blin, precision=HI)
            w = jnp.dot(w, wlin, precision=HI)                            # (3H, D_in)
        wgs.append(w.astype(matmul_dtype))
        bgs.append(b.reshape(3 * H, 1))
    wg0, bg0 = wgs[0], bgs[0]
    wgr = jnp.stack(wgs[1:]) if L > 1 else None                  # (L-1, 3H, H)
    bgr = jnp.stack(bgs[1:]) if L > 1 else None                  # (L-1, 3H, 1)
    gamma = params["ln.weight"].reshape(H, 1)
    beta = params["ln.bias"].reshape(H, 1)
    wfc = params["fc.weight"].reshape(H, 1)                      # (1, H) -> column
    bfc = params["fc.bias"].reshape(1, 1)
    return wg0, bg0, wgr, bgr, gamma, beta, wfc, bfc


def lstm_model_forward(x, params, *, num_layers, hidden_size,
                       batch_tile=128, matmul_dtype=jnp.float32):
    """Full LSTMModel forward in one Pallas kernel, tiled over the batch.

    batch_tile : batch rows mapped to the lane axis per grid step.  Use a
      multiple of 128 (lane width); keep B // batch_tile >= 2 on v7x so both
      TensorCores get a grid step.  Weights stay VMEM-resident (constant
      index_maps), so larger tiles only amortize the ~0.35 us/step overhead.
    matmul_dtype : jnp.bfloat16 halves x/W DMA bytes and doubles the effective
      MXU rate (biggest relative win on v5e); accumulation and all post-matmul
      VPU/EUP math stay in f32.
    """
    B, D_in = x.shape
    L, H = num_layers, hidden_size
    assert B % batch_tile == 0, "batch must be divisible by batch_tile"
    assert batch_tile % 128 == 0 or batch_tile == B, \
        "batch_tile should be a multiple of 128 lanes for dense stores"
    num_tiles = B // batch_tile

    wg0, bg0, wgr, bgr, gamma, beta, wfc, bfc = _prepare_kernel_params(
        params, hidden_size=H, num_layers=L, matmul_dtype=matmul_dtype)
    xT = x.T.astype(matmul_dtype)                 # (D_in, B): batch on lanes

    rep2 = lambda a: pl.BlockSpec(a.shape, lambda i: (0, 0))
    rep3 = lambda a: pl.BlockSpec(a.shape, lambda i: (0, 0, 0))

    args = [xT, wg0, bg0]
    in_specs = [pl.BlockSpec((D_in, batch_tile), lambda i: (0, i)),  # x^T tile
                rep2(wg0),            # fused layer-0 gate weight (3H, D_in)
                rep2(bg0)]            # fused layer-0 gate bias   (3H, 1)
    if L > 1:
        args += [wgr, bgr]
        in_specs += [rep3(wgr),       # layers 1.. gate weights (L-1, 3H, H)
                     rep3(bgr)]       # layers 1.. gate biases  (L-1, 3H, 1)
    args += [gamma, beta, wfc, bfc]
    in_specs += [rep2(gamma), rep2(beta), rep2(wfc), rep2(bfc)]

    kernel = _make_kernel(L, H, 1e-5, matmul_dtype)

    out_row = pl.pallas_call(
        kernel,
        out_shape=jax.ShapeDtypeStruct((1, B), jnp.float32),
        grid=(num_tiles,),
        in_specs=in_specs,
        out_specs=pl.BlockSpec((1, batch_tile), lambda i: (0, i)),  # lane-dense
        compiler_params=pltpu.CompilerParams(
            dimension_semantics=("parallel",)),
    )(*args)

    return out_row.reshape(B, 1)


def reference_forward(x, params, *, num_layers, hidden_size):
    """Pure-JAX mirror of LSTMModel.forward (eval mode, seq_len == 1)."""
    H = hidden_size
    B = x.shape[0]
    h = x @ params["linear.weight"].T + params["linear.bias"]     # (B, H)
    h_layer = h
    for l in range(num_layers):
        h0 = jnp.zeros((B, H), jnp.float32)
        c0 = jnp.zeros((B, H), jnp.float32)
        gates = (h_layer @ params["lstm.weight_ih"][l].T
                 + params["lstm.bias_ih"][l]
                 + h0 @ params["lstm.weight_hh"][l].T
                 + params["lstm.bias_hh"][l])
        i_g = jax.nn.sigmoid(gates[:, 0 * H:1 * H])
        f_g = jax.nn.sigmoid(gates[:, 1 * H:2 * H])
        g_g = jnp.tanh(gates[:, 2 * H:3 * H])
        o_g = jax.nn.sigmoid(gates[:, 3 * H:4 * H])
        c = f_g * c0 + i_g * g_g
        h_layer = o_g * jnp.tanh(c)
    y = h_layer
    mean = jnp.mean(y, axis=-1, keepdims=True)
    var = jnp.mean((y - mean) ** 2, axis=-1, keepdims=True)
    y = (y - mean) / jnp.sqrt(var + 1e-5)
    y = y * params["ln.weight"] + params["ln.bias"]
    # dropout is identity in eval mode
    y = jnp.maximum(y, 0.0)
    return y @ params["fc.weight"].T + params["fc.bias"]


def init_params(key, input_size, hidden_size, num_layers):
    """Deterministic synthetic parameters with PyTorch-native shapes."""
    H, L = hidden_size, num_layers
    ks = iter(jax.random.split(key, 4 + 4 * L))

    def u(shape, scale):
        return jax.random.uniform(next(ks), shape, jnp.float32, -scale, scale)

    s_lin = input_size ** -0.5
    s_lstm = H ** -0.5
    return {
        "linear.weight": u((H, input_size), s_lin),
        "linear.bias": u((H,), s_lin),
        "lstm.weight_ih": jnp.stack([u((4 * H, H), s_lstm) for _ in range(L)]),
        "lstm.weight_hh": jnp.stack([u((4 * H, H), s_lstm) for _ in range(L)]),
        "lstm.bias_ih": jnp.stack([u((4 * H,), s_lstm) for _ in range(L)]),
        "lstm.bias_hh": jnp.stack([u((4 * H,), s_lstm) for _ in range(L)]),
        "ln.weight": jnp.ones((H,), jnp.float32),
        "ln.bias": jnp.zeros((H,), jnp.float32),
        "fc.weight": u((1, H), H ** -0.5),
        "fc.bias": u((1,), H ** -0.5),
    }


if __name__ == "__main__":
    INPUT_SIZE = 16
    HIDDEN_SIZE = 32
    NUM_LAYERS = 2
    BATCH = 256          # small workload, but >= 2 lane-width tiles
    BATCH_TILE = 128     # grid=(2,): fills 128 lanes/step, both v7x TCs busy

    key = jax.random.PRNGKey(0)
    k_x, k_p = jax.random.split(key)
    x = jax.random.normal(k_x, (BATCH, INPUT_SIZE), jnp.float32)
    params = init_params(k_p, INPUT_SIZE, HIDDEN_SIZE, NUM_LAYERS)

    out = lstm_model_forward(x, params,
                             num_layers=NUM_LAYERS, hidden_size=HIDDEN_SIZE,
                             batch_tile=BATCH_TILE,
                             matmul_dtype=jnp.float32)  # bf16 optional (v5e win)
    out = jax.block_until_ready(out)

    ref = jax.block_until_ready(
        reference_forward(x, params,
                          num_layers=NUM_LAYERS, hidden_size=HIDDEN_SIZE))

    assert out.shape == (BATCH, 1)
    assert jnp.allclose(out, ref, rtol=2e-4, atol=2e-5), \
        float(jnp.max(jnp.abs(out - ref)))
    print("KERNEL_OK")
</pallas_src>

<mosaic_0001>
module attributes {stable_mosaic.version = 11 : i64} {
  func.func @kernel(%arg0: i32, %arg1: memref<16x128xf32, #tpu.memory_space<vmem>>, %arg2: memref<96x16xf32, #tpu.memory_space<vmem>>, %arg3: memref<96x1xf32, #tpu.memory_space<vmem>>, %arg4: memref<1x96x32xf32, #tpu.memory_space<vmem>>, %arg5: memref<1x96x1xf32, #tpu.memory_space<vmem>>, %arg6: memref<32x1xf32, #tpu.memory_space<vmem>>, %arg7: memref<32x1xf32, #tpu.memory_space<vmem>>, %arg8: memref<32x1xf32, #tpu.memory_space<vmem>>, %arg9: memref<1x1xf32, #tpu.memory_space<vmem>>, %arg10: memref<1x128xf32, #tpu.memory_space<vmem>>) attributes {dimension_semantics = [#tpu.dimension_semantics<parallel>], iteration_bounds = array<i64: 2>, scalar_prefetch = 0 : i64, scratch_operands = 0 : i64, tpu.core_type = #tpu.core_type<tc>, window_params = [{transform_indices = @transform_0, window_bounds = array<i64: 16, 128>}, {pipeline_mode = #tpu.pipeline_mode<synchronous>, transform_indices = @transform_1, window_bounds = array<i64: 96, 16>}, {pipeline_mode = #tpu.pipeline_mode<synchronous>, transform_indices = @transform_2, window_bounds = array<i64: 96, 1>}, {pipeline_mode = #tpu.pipeline_mode<synchronous>, transform_indices = @transform_3, window_bounds = array<i64: 1, 96, 32>}, {pipeline_mode = #tpu.pipeline_mode<synchronous>, transform_indices = @transform_4, window_bounds = array<i64: 1, 96, 1>}, {pipeline_mode = #tpu.pipeline_mode<synchronous>, transform_indices = @transform_5, window_bounds = array<i64: 32, 1>}, {pipeline_mode = #tpu.pipeline_mode<synchronous>, transform_indices = @transform_6, window_bounds = array<i64: 32, 1>}, {pipeline_mode = #tpu.pipeline_mode<synchronous>, transform_indices = @transform_7, window_bounds = array<i64: 32, 1>}, {pipeline_mode = #tpu.pipeline_mode<synchronous>, transform_indices = @transform_8, window_bounds = array<i64: 1, 1>}, {transform_indices = @transform_9, window_bounds = array<i64: 1, 128>}]} {
    %c0 = arith.constant 0 : index
    %c0_0 = arith.constant 0 : index
    %0 = vector.load %arg2[%c0, %c0_0] : memref<96x16xf32, #tpu.memory_space<vmem>>, vector<96x16xf32>
    %c0_1 = arith.constant 0 : index
    %c0_2 = arith.constant 0 : index
    %1 = vector.load %arg1[%c0_1, %c0_2] : memref<16x128xf32, #tpu.memory_space<vmem>>, vector<16x128xf32>
    %cst = arith.constant dense<0.000000e+00> : vector<96x128xf32>
    %2 = tpu.matmul %0, %1, %cst {dimension_numbers = #tpu.dot_dimension_numbers<[1], [0], [0], [1], [0, 0, 1, 1], [], []>} : vector<96x16xf32>, vector<16x128xf32>, vector<96x128xf32> -> vector<96x128xf32>
    %c0_3 = arith.constant 0 : index
    %c0_4 = arith.constant 0 : index
    %3 = vector.load %arg3[%c0_3, %c0_4] : memref<96x1xf32, #tpu.memory_space<vmem>>, vector<96x1xf32>
    %4 = vector.broadcast %3 : vector<96x1xf32> to vector<96x128xf32>
    %5 = arith.addf %2, %4 : vector<96x128xf32>
    %6 = vector.extract_strided_slice %5 {offsets = [0, 0], sizes = [64, 128], strides = [1, 1]} : vector<96x128xf32> to vector<64x128xf32>
    %7 = math.tanh %6 : vector<64x128xf32>
    %cst_5 = arith.constant 5.000000e-01 : f32
    %8 = vector.broadcast %cst_5 : f32 to vector<64x128xf32>
    %9 = arith.mulf %8, %7 : vector<64x128xf32>
    %cst_6 = arith.constant 5.000000e-01 : f32
    %10 = vector.broadcast %cst_6 : f32 to vector<64x128xf32>
    %11 = arith.addf %9, %10 : vector<64x128xf32>
    %12 = vector.extract_strided_slice %5 {offsets = [64, 0], sizes = [32, 128], strides = [1, 1]} : vector<96x128xf32> to vector<32x128xf32>
    %13 = math.tanh %12 : vector<32x128xf32>
    %14 = vector.extract_strided_slice %11 {offsets = [0, 0], sizes = [32, 128], strides = [1, 1]} : vector<64x128xf32> to vector<32x128xf32>
    %15 = arith.mulf %14, %13 : vector<32x128xf32>
    %16 = vector.extract_strided_slice %11 {offsets = [32, 0], sizes = [32, 128], strides = [1, 1]} : vector<64x128xf32> to vector<32x128xf32>
    %17 = math.tanh %15 : vector<32x128xf32>
    %18 = arith.mulf %16, %17 : vector<32x128xf32>
    %c0_7 = arith.constant 0 : index
    %c0_8 = arith.constant 0 : index
    %c0_9 = arith.constant 0 : index
    %19 = vector.load %arg4[%c0_7, %c0_8, %c0_9] : memref<1x96x32xf32, #tpu.memory_space<vmem>>, vector<1x96x32xf32>
    %20 = vector.shape_cast %19 : vector<1x96x32xf32> to vector<96x32xf32>
    %cst_10 = arith.constant dense<0.000000e+00> : vector<96x128xf32>
    %21 = tpu.matmul %20, %18, %cst_10 {dimension_numbers = #tpu.dot_dimension_numbers<[1], [0], [0], [1], [0, 0, 1, 1], [], []>} : vector<96x32xf32>, vector<32x128xf32>, vector<96x128xf32> -> vector<96x128xf32>
    %c0_11 = arith.constant 0 : index
    %c0_12 = arith.constant 0 : index
    %c0_13 = arith.constant 0 : index
    %22 = vector.load %arg5[%c0_11, %c0_12, %c0_13] : memref<1x96x1xf32, #tpu.memory_space<vmem>>, vector<1x96x1xf32>
    %23 = vector.shape_cast %22 : vector<1x96x1xf32> to vector<96x1xf32>
    %24 = vector.broadcast %23 : vector<96x1xf32> to vector<96x128xf32>
    %25 = arith.addf %21, %24 : vector<96x128xf32>
    %26 = vector.extract_strided_slice %25 {offsets = [0, 0], sizes = [64, 128], strides = [1, 1]} : vector<96x128xf32> to vector<64x128xf32>
    %27 = math.tanh %26 : vector<64x128xf32>
    %cst_14 = arith.constant 5.000000e-01 : f32
    %28 = vector.broadcast %cst_14 : f32 to vector<64x128xf32>
    %29 = arith.mulf %28, %27 : vector<64x128xf32>
    %cst_15 = arith.constant 5.000000e-01 : f32
    %30 = vector.broadcast %cst_15 : f32 to vector<64x128xf32>
    %31 = arith.addf %29, %30 : vector<64x128xf32>
    %32 = vector.extract_strided_slice %25 {offsets = [64, 0], sizes = [32, 128], strides = [1, 1]} : vector<96x128xf32> to vector<32x128xf32>
    %33 = math.tanh %32 : vector<32x128xf32>
    %34 = vector.extract_strided_slice %31 {offsets = [0, 0], sizes = [32, 128], strides = [1, 1]} : vector<64x128xf32> to vector<32x128xf32>
    %35 = arith.mulf %34, %33 : vector<32x128xf32>
    %36 = vector.extract_strided_slice %31 {offsets = [32, 0], sizes = [32, 128], strides = [1, 1]} : vector<64x128xf32> to vector<32x128xf32>
    %37 = math.tanh %35 : vector<32x128xf32>
    %38 = arith.mulf %36, %37 : vector<32x128xf32>
    %cst_16 = arith.constant dense<0.000000e+00> : vector<128xf32>
    %39 = vector.multi_reduction <add>, %38, %cst_16 [0] : vector<32x128xf32> to vector<128xf32>
    %40 = vector.shape_cast %39 : vector<128xf32> to vector<1x128xf32>
    %cst_17 = arith.constant 3.200000e+01 : f32
    %41 = vector.broadcast %cst_17 : f32 to vector<1x128xf32>
    %42 = arith.divf %40, %41 : vector<1x128xf32>
    %43 = vector.broadcast %42 : vector<1x128xf32> to vector<32x128xf32>
    %44 = arith.subf %38, %43 : vector<32x128xf32>
    %45 = arith.mulf %44, %44 : vector<32x128xf32>
    %cst_18 = arith.constant dense<0.000000e+00> : vector<128xf32>
    %46 = vector.multi_reduction <add>, %45, %cst_18 [0] : vector<32x128xf32> to vector<128xf32>
    %47 = vector.shape_cast %46 : vector<128xf32> to vector<1x128xf32>
    %cst_19 = arith.constant 3.200000e+01 : f32
    %48 = vector.broadcast %cst_19 : f32 to vector<1x128xf32>
    %49 = arith.divf %47, %48 : vector<1x128xf32>
    %cst_20 = arith.constant 9.99999974E-6 : f32
    %50 = vector.broadcast %cst_20 : f32 to vector<1x128xf32>
    %51 = arith.addf %49, %50 : vector<1x128xf32>
    %52 = math.rsqrt %51 : vector<1x128xf32>
    %53 = vector.broadcast %52 : vector<1x128xf32> to vector<32x128xf32>
    %54 = arith.mulf %44, %53 : vector<32x128xf32>
    %c0_21 = arith.constant 0 : index
    %c0_22 = arith.constant 0 : index
    %55 = vector.load %arg6[%c0_21, %c0_22] : memref<32x1xf32, #tpu.memory_space<vmem>>, vector<32x1xf32>
    %56 = vector.broadcast %55 : vector<32x1xf32> to vector<32x128xf32>
    %57 = arith.mulf %54, %56 : vector<32x128xf32>
    %c0_23 = arith.constant 0 : index
    %c0_24 = arith.constant 0 : index
    %58 = vector.load %arg7[%c0_23, %c0_24] : memref<32x1xf32, #tpu.memory_space<vmem>>, vector<32x1xf32>
    %59 = vector.broadcast %58 : vector<32x1xf32> to vector<32x128xf32>
    %60 = arith.addf %57, %59 : vector<32x128xf32>
    %cst_25 = arith.constant 0.000000e+00 : f32
    %61 = vector.broadcast %cst_25 : f32 to vector<32x128xf32>
    %62 = arith.maximumf %60, %61 : vector<32x128xf32>
    %c0_26 = arith.constant 0 : index
    %c0_27 = arith.constant 0 : index
    %63 = vector.load %arg8[%c0_26, %c0_27] : memref<32x1xf32, #tpu.memory_space<vmem>>, vector<32x1xf32>
    %64 = vector.broadcast %63 : vector<32x1xf32> to vector<32x128xf32>
    %65 = arith.mulf %62, %64 : vector<32x128xf32>
    %cst_28 = arith.constant dense<0.000000e+00> : vector<128xf32>
    %66 = vector.multi_reduction <add>, %65, %cst_28 [0] : vector<32x128xf32> to vector<128xf32>
    %67 = vector.shape_cast %66 : vector<128xf32> to vector<1x128xf32>
    %c0_29 = arith.constant 0 : index
    %c0_30 = arith.constant 0 : index
    %68 = vector.load %arg9[%c0_29, %c0_30] : memref<1x1xf32, #tpu.memory_space<vmem>>, vector<1x1xf32>
    %69 = vector.broadcast %68 : vector<1x1xf32> to vector<1x128xf32>
    %70 = arith.addf %67, %69 : vector<1x128xf32>
    %c0_31 = arith.constant 0 : index
    %c0_32 = arith.constant 0 : index
    %71 = vector.load %arg10[%c0_31, %c0_32] : memref<1x128xf32, #tpu.memory_space<vmem>>, vector<1x128xf32>
    tpu.vector_store %arg10[%c0_31, %c0_32], %70 {strides = array<i32>} : memref<1x128xf32, #tpu.memory_space<vmem>>, vector<1x128xf32>,
    return
  }
  func.func @transform_0(%arg0: i32) -> (i32, i32) {
    %c0_i32 = arith.constant 0 : i32
    %c0_i32_0 = arith.constant 0 : i32
    return %c0_i32, %arg0 : i32, i32
  }
  func.func @transform_1(%arg0: i32) -> (i32, i32) {
    %c0_i32 = arith.constant 0 : i32
    %c0_i32_0 = arith.constant 0 : i32
    %c0_i32_1 = arith.constant 0 : i32
    return %c0_i32, %c0_i32_0 : i32, i32
  }
  func.func @transform_2(%arg0: i32) -> (i32, i32) {
    %c0_i32 = arith.constant 0 : i32
    %c0_i32_0 = arith.constant 0 : i32
    %c0_i32_1 = arith.constant 0 : i32
    return %c0_i32, %c0_i32_0 : i32, i32
  }
  func.func @transform_3(%arg0: i32) -> (i32, i32, i32) {
    %c0_i32 = arith.constant 0 : i32
    %c0_i32_0 = arith.constant 0 : i32
    %c0_i32_1 = arith.constant 0 : i32
    %c0_i32_2 = arith.constant 0 : i32
    return %c0_i32, %c0_i32_0, %c0_i32_1 : i32, i32, i32
  }
  func.func @transform_4(%arg0: i32) -> (i32, i32, i32) {
    %c0_i32 = arith.constant 0 : i32
    %c0_i32_0 = arith.constant 0 : i32
    %c0_i32_1 = arith.constant 0 : i32
    %c0_i32_2 = arith.constant 0 : i32
    return %c0_i32, %c0_i32_0, %c0_i32_1 : i32, i32, i32
  }
  func.func @transform_5(%arg0: i32) -> (i32, i32) {
    %c0_i32 = arith.constant 0 : i32
    %c0_i32_0 = arith.constant 0 : i32
    %c0_i32_1 = arith.constant 0 : i32
    return %c0_i32, %c0_i32_0 : i32, i32
  }
  func.func @transform_6(%arg0: i32) -> (i32, i32) {
    %c0_i32 = arith.constant 0 : i32
    %c0_i32_0 = arith.constant 0 : i32
    %c0_i32_1 = arith.constant 0 : i32
    return %c0_i32, %c0_i32_0 : i32, i32
  }
  func.func @transform_7(%arg0: i32) -> (i32, i32) {
    %c0_i32 = arith.constant 0 : i32
    %c0_i32_0 = arith.constant 0 : i32
    %c0_i32_1 = arith.constant 0 : i32
    return %c0_i32, %c0_i32_0 : i32, i32
  }
  func.func @transform_8(%arg0: i32) -> (i32, i32) {
    %c0_i32 = arith.constant 0 : i32
    %c0_i32_0 = arith.constant 0 : i32
    %c0_i32_1 = arith.constant 0 : i32
    return %c0_i32, %c0_i32_0 : i32, i32
  }
  func.func @transform_9(%arg0: i32) -> (i32, i32) {
    %c0_i32 = arith.constant 0 : i32
    %c0_i32_0 = arith.constant 0 : i32
    return %c0_i32, %arg0 : i32, i32
  }
}

</mosaic_0001>

<bundles_post_ra>
// kernel: tpu_custom_call.1
= control target key start
LH: loop header
LB: loop body
LE: loop exit
PB: predicated region body
PF: predicated region fallthrough
CT: control target
= control target key end

     0   :  { %s1827_s0 = inlined_call_operand.vmem [shape: f32[16,256], index: 0, kind: input, shape index: {}]   ;;  %s1828_s1 = inlined_call_operand.vmem [shape: f32[96,16], index: 1, kind: input, shape index: {}]   ;;  %s1829_s2 = inlined_call_operand.vmem [shape: f32[96,1], index: 2, kind: input, shape index: {}]   ;;  %s1830_s3 = inlined_call_operand.vmem [shape: f32[1,96,32], index: 3, kind: input, shape index: {}]   ;;  %s1831_s4 = inlined_call_operand.vmem [shape: f32[1,96,1], index: 4, kind: input, shape index: {}]   ;;  %s1832_s5 = inlined_call_operand.vmem [shape: f32[32,1], index: 5, kind: input, shape index: {}]   ;;  %s1833_s6 = inlined_call_operand.vmem [shape: f32[32,1], index: 6, kind: input, shape index: {}]   ;;  %s1834_s7 = inlined_call_operand.vmem [shape: f32[32,1], index: 7, kind: input, shape index: {}]   ;;  %s1835_s8 = inlined_call_operand.<no memory space> [shape: f32[1,1], index: 8, kind: input, shape index: {}]   ;;  %s1836_s9 = inlined_call_operand.hbm [shape: f32[1,256], index: 9, kind: output, shape index: {}]  }
   0x1   :  { %v14_v0 = vstv %s1835_s8 }
   0x2   :  { %15 = vst [vmem:[#allocation2] sm:$0x1] %v14_v0 }
   0x3   :  { %16 = vsyncpa [#allocation5], 0 }
   0x4   :  { %18 = vsyncpa [#allocation5 + $0x1], 0  ;;  %s1513_s11 = smov 0   ;;  %s1515_s12 = smov 0  }
   0x5   :  { %s1517_s13 = smov 0   ;;  %s1519_s14 = smov 0  }
   0x6 LB: > { %s1161_s8 = sadd.s32 4294967295, %s1456_s14   ;;  %s1162_s15 = sadd.s32 4294967294, %s1456_s14   ;;  %s1456_s14 = sphi %s1519_s14, %s1842_s14   ;;  %s1452_s13 = sphi %s1517_s13, %s1841_s13   ;;  %s1448_s12 = sphi %s1515_s12, %s1840_s12   ;;  %s1444_s11 = sphi %s1513_s11, %s1839_s11  }
   0x7   : > { %s1536_s16 = sadd.s32 1, %s1456_s14   ;;  %s31_s17 = sadd.s32 1, %s1452_s13 }
   0x8   : > { %s28_s18 = ssub.s32 %s1456_s14, %s1536_s16  ;;  %p38_p0 = scmp.ne.s32.totalorder %s1452_s13, %s1448_s12 }
   0x9   : > { %p29_p1 = scmp.eq.s32.totalorder %s28_s18, 0  ;;  %p39_p2 = scmp.eq.s32.totalorder %s1456_s14, 0 }
   0xa   : > { %p236_p3 = scmp.eq.s32.totalorder %s1161_s8, 1  ;;  %p241_p4 = scmp.ne.s32.totalorder %s1448_s12, %s1444_s11 }
   0xb   : > { %s1549_s19 = scalar_select %p29_p1, %s1452_s13, %s31_s17  }
   0xc   : > { %p40_p5 = por %p39_p2, %p38_p0  ;;  %p1551_p6 = por %p236_p3, %p38_p0 }
   0xd   : > { %p242_p7 = scmp.eq.s32.totalorder %s1162_s15, 1  ;;  %p1164_p9 = scmp.ge.s32.totalorder %s1456_s14, 2 }
   0xf   : > { %p1555_p8 = por %p242_p7, %p241_p4  ;;  %282 = sbr.rel (%p1164_p9) target bundleno = 29 (0x1d), region = 48 }
  0x16   : > { %285 = sbr.rel (!%p40_p5) target bundleno = 29 (0x1d), region = 52  ;;  %s287_s22 = sand.u32 (%p40_p5), 1, %s1452_s13  }
  0x17   : > { %s1166_s23 = sshll.u32 (%p40_p5), %s1456_s14, 3  ;;  %s1165_s24 = sshll.u32 (%p40_p5), %s287_s22, 4 }
  0x18   : > { %s291_s27 = scalar_lea.vmem (%p40_p5), %s1827_s0, %s1166_s23  ;;  %s289_s28 = scalar_lea.vmem (%p40_p5), [#allocation3], %s1165_s24 }
  0x19   : > { %v321_v1 = vld [vmem:[%s291_s27] sm:$0xff] (%p40_p5)  ;;  %v323_v2 = vld [vmem:[%s291_s27 + $0x10] sm:$0xff] (%p40_p5) }
  0x1a   : > { %322 = vst [vmem:[%s289_s28] sm:$0xff] (%p40_p5), %v321_v1  ;;  %324 = vst [vmem:[%s289_s28 + $0x8] sm:$0xff] (%p40_p5), %v323_v2 }
  0x1d PF: > { %p1167_p10 = scmp.ge.s32.totalorder %s1456_s14, 1  ;;  %p329_p11 = scmp.lt.s32.totalorder %s1456_s14, 3 }
  0x1f   : > { %p330_p12 = pnand %p1167_p10, %p329_p11 }
  0x20   : > { %s1570_s29 = sand.u32 (!%p330_p12), 1, %s1448_s12   ;;  %v370_v3 = vld [vmem:[%s1828_s1] sm:$0xff] (!%p330_p12)  ;;  %vm456_vm0 = vcmask (!%p330_p12), 130048   ;;  %v1458_v4 = vmov (!%p330_p12), 0   ;;  %v386_v9 = vld [vmem:[%s1829_s2 + $0x10] sm:$0xff] (!%p330_p12)  ;;  %v385_v10 = vld [vmem:[%s1829_s2 + $0x8] sm:$0xff] (!%p330_p12) }
  0x21   : > { %333 = sbr.rel (%p330_p12) target bundleno = 669 (0x29d), region = 90  ;;  %s1168_s15 = sshll.u32 (!%p330_p12), %s1570_s29, 4  ;;  %1230 = vmatprep.mubr.msk.f32.mxu0 (!%p330_p12), %vm456_vm0, %v370_v3  ;;  %1326 = vset.pattern.permute.xlu0 (!%p330_p12), %v1458_v4  ;;  %v384_v8 = vld [vmem:[%s1829_s2] sm:$0xff] (!%p330_p12)  ;;  %v371_v11 = vld [vmem:[%s1828_s1 + $0x8] sm:$0xff] (!%p330_p12)  ;;  %v387_v12 = vld [vmem:[%s1829_s2 + $0x18] sm:$0xff] (!%p330_p12)  ;;  %vm742_vm1 = vcmask (!%p330_p12), 261120  }
  0x22   : > { %1327 = vset.pattern.permute.xlu1 (!%p330_p12), %v1458_v4  ;;  %s338_s17 = scalar_lea.vmem (!%p330_p12), [#allocation3], %s1168_s15  ;;  %398 = vperm.xlu0 (!%p330_p12), %1326, %v384_v8   ;;  %v372_v13 = vld [vmem:[%s1828_s1 + $0x10] sm:$0xff] (!%p330_p12)  ;;  %v392_v14 = vld [vmem:[%s1829_s2 + $0x40] sm:$0xff] (!%p330_p12)  ;;  %v373_v15 = vld [vmem:[%s1828_s1 + $0x18] sm:$0xff] (!%p330_p12)  ;;  %s1193_s15 = sshll.u32 (!%p330_p12), %s1161_s8, 4 }
  0x23   : > { %v382_v5 = vld [vmem:[%s338_s17] sm:$0xff] (!%p330_p12)  ;;  %v383_v6 = vld [vmem:[%s338_s17 + $0x8] sm:$0xff] (!%p330_p12)  ;;  %408 = vperm.xlu1 (!%p330_p12), %1327, %v386_v9   ;;  %s369_s17 = scalar_lea.vmem (!%p330_p12), [#allocation4], %s1570_s29  ;;  %s1783_s24 = scalar_lea.hbm (!%p330_p12), %s1836_s9, %s1193_s15 }
  0x24   : > { %v1274_v7 = vpack.c.bf16 (!%p330_p12), %v383_v6, %v382_v5  ;;  %v393_v16 = vld [vmem:[%s1829_s2 + $0x48] sm:$0xff] (!%p330_p12)  ;;  %v374_v17 = vld [vmem:[%s1828_s1 + $0x20] sm:$0xff] (!%p330_p12)  ;;  %v394_v18 = vld [vmem:[%s1829_s2 + $0x50] sm:$0xff] (!%p330_p12)  ;;  %s1101_s18 = sshll.u32 (!%p330_p12), %s369_s17, 4  ;;  %s1089_s25 = scalar_lea.sflag (!%p330_p12), [#allocation5], %s1570_s29  ;;  %s1785_s18 = int_to_ptr.vmem [resolvable:$true] %s1101_s18 }
  0x25   : > { %v375_v19 = vld [vmem:[%s1828_s1 + $0x28] sm:$0xff] (!%p330_p12)  ;;  %v395_v20 = vld [vmem:[%s1829_s2 + $0x58] sm:$0xff] (!%p330_p12)  ;;  %v376_v21 = vld [vmem:[%s1828_s1 + $0x30] sm:$0xff] (!%p330_p12)  ;;  %s1394_s26 = scalar_lea.vmem (!%p330_p12), %s1785_s18, 16  ;;  %s1459_s8 = smov (!%p330_p12), [#allocation4]  }
  0x26   : > { %1275 = vmatprep.subr.bf16.mxu0 (!%p330_p12), %v1274_v7  ;;  %403 = vperm.xlu0 (!%p330_p12), %1326, %v385_v10   ;;  %v388_v22 = vld [vmem:[%s1829_s2 + $0x20] sm:$0xff] (!%p330_p12)  ;;  %v377_v23 = vld [vmem:[%s1828_s1 + $0x38] sm:$0xff] (!%p330_p12)  ;;  %v389_v24 = vld [vmem:[%s1829_s2 + $0x28] sm:$0xff] (!%p330_p12)  ;;  %p1395_p13 = scmp.ne.s32.totalorder (!%p330_p12), %s1785_s18, %s1394_s26  ;;  %s1398_s27 = sshll.u32 (!%p330_p12), %s1459_s8, 4  ;;  %s1399_s27 = int_to_ptr.vmem [resolvable:$false] %s1398_s27 }
  0x27   : > { %1277 = vmatpush3.bf16.msra.mxu0 (!%p330_p12), %v1274_v7  ;;  %413 = vperm.xlu1 (!%p330_p12), %1327, %v387_v12   ;;  %v378_v25 = vld [vmem:[%s1828_s1 + $0x40] sm:$0xff] (!%p330_p12)  ;;  %v390_v26 = vld [vmem:[%s1829_s2 + $0x30] sm:$0xff] (!%p330_p12)  ;;  %v379_v27 = vld [vmem:[%s1828_s1 + $0x48] sm:$0xff] (!%p330_p12)  ;;  %s1400_s28 = scalar_lea.vmem (!%p330_p12), %s1399_s27, 32  ;;  %p1401_p2 = scmp.lt.s32.totalorder (!%p330_p12), %s1785_s18, %s1399_s27 }
  0x28   : > { %v391_v28 = vld [vmem:[%s1829_s2 + $0x38] sm:$0xff]  ;;  %v380_v29 = vld [vmem:[%s1828_s1 + $0x50] sm:$0xff]  ;;  %v670_v30 = vld [vmem:[%s1831_s4] sm:$0xff]  ;;  %p1396_p0 = pnand %p1395_p13, %p1551_p6  ;;  %p1402_p3 = scmp.lt.s32.totalorder %s1400_s28, %s1394_s26 }
  0x29   : > { %v381_v31 = vld [vmem:[%s1828_s1 + $0x58] sm:$0xff]  ;;  %v671_v32 = vld [vmem:[%s1831_s4 + $0x8] sm:$0xff]  ;;  %v672_v33 = vld [vmem:[%s1831_s4 + $0x10] sm:$0xff] }
  0x2a   : > { %1231 = vmatmul.mubr.msk.f32.vlgmr.msra.gmra.mrb[0].mxu0 %vm456_vm0, %v371_v11  ;;  %438 = vperm.xlu0 %1326, %v392_v14   ;;  %v673_v34 = vld [vmem:[%s1831_s4 + $0x18] sm:$0xff]  ;;  %v678_v35 = vld [vmem:[%s1831_s4 + $0x40] sm:$0xff]  ;;  %v679_v36 = vld [vmem:[%s1831_s4 + $0x48] sm:$0xff]  ;;  %p1397_p1 = pneg %p1396_p0  ;;  %p1403_p4 = por %p1402_p3, %p1401_p2 }
  0x2b   : > { %1233 = vmatprep.mubr.msk.f32.mxu0 %vm456_vm0, %v372_v13  ;;  %443 = vperm.xlu1 %1327, %v393_v16   ;;  %v680_v37 = vld [vmem:[%s1831_s4 + $0x50] sm:$0xff]  ;;  %v681_v38 = vld [vmem:[%s1831_s4 + $0x58] sm:$0xff]  ;;  %v674_v39 = vld [vmem:[%s1831_s4 + $0x20] sm:$0xff] }
  0x2c   : > { %v675_v40 = vld [vmem:[%s1831_s4 + $0x28] sm:$0xff]  ;;  %v676_v41 = vld [vmem:[%s1831_s4 + $0x30] sm:$0xff]  ;;  %v677_v42 = vld [vmem:[%s1831_s4 + $0x38] sm:$0xff]  ;;  %p1404_p5 = pnand %p1403_p4, %p1397_p1 }
  0x2d   : > { %v979_v43 = vld [vmem:[%s1832_s5] sm:$0xff]  ;;  %v980_v44 = vld [vmem:[%s1832_s5 + $0x8] sm:$0xff]  ;;  %v981_v45 = vld [vmem:[%s1832_s5 + $0x10] sm:$0xff] }
  0x2e   : > { %1234 = vmatmul.mubr.msk.f32.gmra.mrb[2].mxu0 %vm456_vm0, %v373_v15  ;;  %448 = vperm.xlu0 %1326, %v394_v18   ;;  %v1007_v46 = vld [vmem:[%s1833_s6] sm:$0xff]  ;;  %v1008_v47 = vld [vmem:[%s1833_s6 + $0x8] sm:$0xff]  ;;  %v982_v48 = vld [vmem:[%s1832_s5 + $0x18] sm:$0xff] }
  0x2f   : > { %1236 = vmatprep.mubr.msk.f32.mxu0 %vm456_vm0, %v374_v17  ;;  %453 = vperm.xlu1 %1327, %v395_v20   ;;  %v1009_v49 = vld [vmem:[%s1833_s6 + $0x10] sm:$0xff]  ;;  %v1010_v50 = vld [vmem:[%s1833_s6 + $0x18] sm:$0xff]  ;;  %v1039_v51 = vld [vmem:[%s1834_s7] sm:$0xff] }
  0x30   : > { %v1040_v52 = vld [vmem:[%s1834_s7 + $0x8] sm:$0xff]  ;;  %v1041_v53 = vld [vmem:[%s1834_s7 + $0x10] sm:$0xff]  ;;  %v1042_v54 = vld [vmem:[%s1834_s7 + $0x18] sm:$0xff] }
  0x31   : > { %v1076_v55 = vld [vmem:[#allocation2] sm:$0x1] }
  0x32   : > { %1237 = vmatmul.mubr.msk.f32.gmra.mrb[4].mxu0 %vm456_vm0, %v375_v19  ;;  %418 = vperm.xlu0 %1326, %v388_v22   ;;  %v658_v56 = vld [vmem:[%s1830_s3] sm:$0xff] }
  0x33   : > { %1239 = vmatprep.mubr.msk.f32.mxu0 %vm456_vm0, %v376_v21  ;;  %423 = vperm.xlu1 %1327, %v389_v24  }
  0x34   : > { %1256 = vmatprep.mubr.msk.f32.mxu1 %vm742_vm1, %v658_v56 }
  0x36   : > { %1240 = vmatmul.mubr.msk.f32.gmra.mrb[6].mxu0 %vm456_vm0, %v377_v23  ;;  %428 = vperm.xlu0 %1326, %v390_v26  }
  0x37   : > { %1242 = vmatprep.mubr.msk.f32.mxu0 %vm456_vm0, %v378_v25  ;;  %433 = vperm.xlu1 %1327, %v391_v28  }
  0x3a   : > { %1243 = vmatmul.mubr.msk.f32.gmra.mrb[8].mxu0 %vm456_vm0, %v379_v27  ;;  %684 = vperm.xlu0 %1326, %v670_v30  }
  0x3b   : > { %1245 = vmatprep.mubr.msk.f32.mxu0 %vm456_vm0, %v380_v29  ;;  %689 = vperm.xlu1 %1327, %v671_v32  }
  0x3e   : > { %1246 = vmatmul.mubr.msk.f32.gmra.mrb[10].mxu0 %vm456_vm0, %v381_v31  ;;  %694 = vperm.xlu0 %1326, %v672_v33  }
  0x3f   : > { %699 = vperm.xlu1 %1327, %v673_v34  }
  0x42   : > { %724 = vperm.xlu0 %1326, %v678_v35  }
  0x43   : > { %729 = vperm.xlu1 %1327, %v679_v36  }
  0x46   : > { %734 = vperm.xlu0 %1326, %v680_v37  }
  0x47   : > { %739 = vperm.xlu1 %1327, %v681_v38  }
  0x4a   : > { %704 = vperm.xlu0 %1326, %v674_v39  }
  0x4b   : > { %709 = vperm.xlu1 %1327, %v675_v40  }
  0x4e   : > { %714 = vperm.xlu0 %1326, %v676_v41  }
  0x4f   : > { %719 = vperm.xlu1 %1327, %v677_v42  }
  0x52   : > { %985 = vperm.xlu0 %1326, %v979_v43  }
  0x53   : > { %990 = vperm.xlu1 %1327, %v980_v44  }
  0x56   : > { %995 = vperm.xlu0 %1326, %v981_v45  }
  0x57   : > { %1013 = vperm.xlu1 %1327, %v1007_v46  }
  0x5a   : > { %1018 = vperm.xlu0 %1326, %v1008_v47  }
  0x5b   : > { %1000 = vperm.xlu1 %1327, %v982_v48  }
  0x5e   : > { %1023 = vperm.xlu0 %1326, %v1009_v49  }
  0x5f   : > { %1028 = vperm.xlu1 %1327, %v1010_v50  }
  0x62   : > { %1045 = vperm.xlu0 %1326, %v1039_v51  }
  0x63   : > { %1050 = vperm.xlu1 %1327, %v1040_v52  }
  0x66   : > { %1055 = vperm.xlu0 %1326, %v1041_v53  }
  0x67   : > { %1060 = vperm.xlu1 %1327, %v1042_v54  }
  0x6a   : > { %1079 = vperm.xlu0 %1326, %v1076_v55  }
  0xa1   : > { %v399_v58 = vpop.permute.xlu0 %398 }
  0xa2   : > { %v409_v57 = vpop.permute.xlu1 %408 }
  0xa5   : > { %v404_v60 = vpop.permute.xlu0 %403 }
  0xa6   : > { %v414_v59 = vpop.permute.xlu1 %413 }
  0xa9   : > { %v439_v2 = vpop.permute.xlu0 %438 }
  0xaa   : > { %v444_v0 = vpop.permute.xlu1 %443 }
  0xad   : > { %v449_v9 = vpop.permute.xlu0 %448 }
  0xae   : > { %v454_v7 = vpop.permute.xlu1 %453 }
  0xb1   : > { %v419_v17 = vpop.permute.xlu0 %418 }
  0xb2   : > { %v424_v14 = vpop.permute.xlu1 %423 }
  0xb5   : > { %v429_v28 = vpop.permute.xlu0 %428 }
  0xb6   : > { %v434_v27 = vpop.permute.xlu1 %433 }
  0xfd   : > { %v1232_v61 = vpop.f32.mrb[0].mxu0 }
  0xfe   : > { %v559_v62 = vpop.f32.mrb[1].mxu0  ;;  %v565_v3 = vadd.f32 %v1232_v61, %v404_v60 }
  0xff   : > { %v560_v4 = vadd.f32 %v559_v62, %v399_v58 }
 0x100   : > { %1328 = vtanh.f32 %v565_v3 }
 0x101   : > { %v1235_v63 = vpop.f32.mrb[2].mxu0  ;;  %1330 = vtanh.f32 %v560_v4 }
 0x102   : > { %v569_v1 = vpop.f32.mrb[3].mxu0  ;;  %v575_v8 = vadd.f32 %v1235_v63, %v414_v59 }
 0x103   : > { %v570_v10 = vadd.f32 %v569_v1, %v409_v57 }
 0x104   : > { %1332 = vtanh.f32 %v575_v8  ;;  %v660_v8 = vld [vmem:[%s1830_s3 + $0x10] sm:$0xff] }
 0x105   : > { %v1238_v5 = vpop.f32.mrb[4].mxu0  ;;  %1334 = vtanh.f32 %v570_v10  ;;  %v662_v10 = vld [vmem:[%s1830_s3 + $0x20] sm:$0xff] }
 0x106   : > { %v579_v6 = vpop.f32.mrb[5].mxu0  ;;  %v585_v18 = vadd.f32 %v1238_v5, %v424_v14  ;;  %v666_v14 = vld [vmem:[%s1830_s3 + $0x40] sm:$0xff] }
 0x107   : > { %v580_v22 = vadd.f32 %v579_v6, %v419_v17  ;;  %v669_v17 = vld [vmem:[%s1830_s3 + $0x58] sm:$0xff] }
 0x109   : > { %v1241_v11 = vpop.f32.mrb[6].mxu0 }
 0x10a   : > { %v589_v12 = vpop.f32.mrb[7].mxu0  ;;  %v1329_v21 = vpop.eup %1328  ;;  %v595_v30 = vadd.f32 %v1241_v11, %v434_v27  ;;  %v663_v11 = vld [vmem:[%s1830_s3 + $0x28] sm:$0xff] }
 0x10b   : > { %v1331_v25 = vpop.eup %1330  ;;  %v627_v29 = vmul.f32 0.5, %v1329_v21  ;;  %v590_v33 = vadd.f32 %v589_v12, %v429_v28  ;;  %v664_v12 = vld [vmem:[%s1830_s3 + $0x30] sm:$0xff] }
 0x10c   : > { %v626_v32 = vmul.f32 0.5, %v1331_v25 }
 0x10d   : > { %v1244_v13 = vpop.f32.mrb[8].mxu0  ;;  %v635_v35 = vadd.f32 0.5, %v627_v29 }
 0x10e   : > { %v605_v15 = vadd.f32 %v1244_v13, %v444_v0  ;;  %v599_v16 = vpop.f32.mrb[9].mxu0  ;;  %v1333_v31 = vpop.eup %1332  ;;  %v634_v38 = vadd.f32 0.5, %v626_v32  ;;  %v665_v13 = vld [vmem:[%s1830_s3 + $0x38] sm:$0xff] }
 0x10f   : > { %v600_v19 = vadd.f32 %v599_v16, %v439_v2  ;;  %v1335_v34 = vpop.eup %1334  ;;  %v629_v36 = vmul.f32 0.5, %v1333_v31  ;;  %v668_v16 = vld [vmem:[%s1830_s3 + $0x50] sm:$0xff] }
 0x110   : > { %1336 = vtanh.f32 %v605_v15  ;;  %v628_v39 = vmul.f32 0.5, %v1335_v34  ;;  %v667_v15 = vld [vmem:[%s1830_s3 + $0x48] sm:$0xff] }
 0x111   : > { %1338 = vtanh.f32 %v600_v19  ;;  %v1247_v20 = vpop.f32.mrb[10].mxu0  ;;  %v637_v44 = vadd.f32 0.5, %v629_v36  ;;  %v685_v19 = vpop.permute.xlu0 %684 }
 0x112   : > { %v615_v23 = vadd.f32 %v1247_v20, %v454_v7  ;;  %v609_v24 = vpop.f32.mrb[11].mxu0  ;;  %1340 = vtanh.f32 %v585_v18  ;;  %v636_v46 = vadd.f32 0.5, %v628_v39  ;;  %v659_v7 = vld [vmem:[%s1830_s3 + $0x8] sm:$0xff]  ;;  %v690_v18 = vpop.permute.xlu1 %689 }
 0x113   : > { %v610_v26 = vadd.f32 %v609_v24, %v449_v9  ;;  %v661_v9 = vld [vmem:[%s1830_s3 + $0x18] sm:$0xff] }
 0x114   : > { %1342 = vtanh.f32 %v615_v23 }
 0x115   : > { %1344 = vtanh.f32 %v610_v26  ;;  %v695_v21 = vpop.permute.xlu0 %694 }
 0x116   : > { %1346 = vtanh.f32 %v580_v22  ;;  %v700_v20 = vpop.permute.xlu1 %699 }
 0x117   : > { %1348 = vtanh.f32 %v595_v30 }
 0x118   : > { %1350 = vtanh.f32 %v590_v33 }
 0x119   : > { %v725_v27 = vpop.permute.xlu0 %724 }
 0x11a   : > { %v1337_v37 = vpop.eup %1336  ;;  %v730_v25 = vpop.permute.xlu1 %729 }
 0x11b   : > { %v1339_v40 = vpop.eup %1338  ;;  %v647_v41 = vmul.f32 %v1337_v37, %v635_v35 }
 0x11c   : > { %v646_v42 = vmul.f32 %v1339_v40, %v634_v38  ;;  %v1341_v43 = vpop.eup %1340 }
 0x11d   : > { %1352 = vtanh.f32 %v647_v41  ;;  %v631_v51 = vmul.f32 0.5, %v1341_v43  ;;  %v735_v34 = vpop.permute.xlu0 %734 }
 0x11e   : > { %v1343_v45 = vpop.eup %1342  ;;  %1354 = vtanh.f32 %v646_v42  ;;  %v740_v32 = vpop.permute.xlu1 %739 }
 0x11f   : > { %v1345_v47 = vpop.eup %1344  ;;  %v649_v48 = vmul.f32 %v1343_v45, %v637_v44  ;;  %v639_v55 = vadd.f32 0.5, %v631_v51 }
 0x120   : > { %v1347_v49 = vpop.eup %1346  ;;  %v648_v50 = vmul.f32 %v1345_v47, %v636_v46 }
 0x121   : > { %1356 = vtanh.f32 %v649_v48  ;;  %v1349_v52 = vpop.eup %1348  ;;  %v630_v53 = vmul.f32 0.5, %v1347_v49  ;;  %v705_v42 = vpop.permute.xlu0 %704 }
 0x122   : > { %1358 = vtanh.f32 %v648_v50  ;;  %v1351_v54 = vpop.eup %1350  ;;  %v633_v56 = vmul.f32 0.5, %v1349_v52  ;;  %v710_v39 = vpop.permute.xlu1 %709 }
 0x123   : > { %v638_v58 = vadd.f32 0.5, %v630_v53  ;;  %v632_v59 = vmul.f32 0.5, %v1351_v54 }
 0x124   : > { %v641_v63 = vadd.f32 0.5, %v633_v56 }
 0x125   : > { %v640_v1 = vadd.f32 0.5, %v632_v59  ;;  %v715_v53 = vpop.permute.xlu0 %714 }
 0x126   : > { %v720_v52 = vpop.permute.xlu1 %719 }
 0x127   : > { %v1353_v57 = vpop.eup %1352 }
 0x128   : > { %v1355_v60 = vpop.eup %1354  ;;  %v655_v61 = vmul.f32 %v1353_v57, %v639_v55 }
 0x129   : > { %v654_v62 = vmul.f32 %v1355_v60, %v638_v58 }
 0x12b   : > { %v1357_v0 = vpop.eup %1356  ;;  %v1278_v2 = vpack.c.bf16 %v655_v61, %v654_v62 }
 0x12c   : > { %v1359_v3 = vpop.eup %1358  ;;  %v657_v4 = vmul.f32 %v1357_v0, %v641_v63 }
 0x12d   : > { %1279 = vmatprep.subr.bf16.mxu1 %v1278_v2  ;;  %v656_v5 = vmul.f32 %v1359_v3, %v640_v1 }
 0x12e   : > { %1281 = vmatpush3.bf16.msra.mxu1 %v1278_v2 }
 0x12f   : > { %v1282_v6 = vpack.c.bf16 %v657_v4, %v656_v5 }
 0x131   : > { %1283 = vmatprep.subr.bf16.mxu1 %v1282_v6 }
 0x132   : > { %1285 = vmatpush3.bf16.msra.mxu1 %v1282_v6 }
 0x135   : > { %1257 = vmatmul.mubr.msk.f32.vlgmr.msra.gmra.mrb[0].mxu1 %vm742_vm1, %v659_v7 }
 0x136   : > { %1259 = vmatprep.mubr.msk.f32.mxu1 %vm742_vm1, %v660_v8 }
 0x139   : > { %1260 = vmatmul.mubr.msk.f32.gmra.mrb[2].mxu1 %vm742_vm1, %v661_v9 }
 0x13a   : > { %1262 = vmatprep.mubr.msk.f32.mxu1 %vm742_vm1, %v662_v10 }
 0x13d   : > { %1263 = vmatmul.mubr.msk.f32.gmra.mrb[4].mxu1 %vm742_vm1, %v663_v11 }
 0x13e   : > { %1265 = vmatprep.mubr.msk.f32.mxu1 %vm742_vm1, %v664_v12 }
 0x141   : > { %1266 = vmatmul.mubr.msk.f32.gmra.mrb[6].mxu1 %vm742_vm1, %v665_v13 }
 0x142   : > { %1268 = vmatprep.mubr.msk.f32.mxu1 %vm742_vm1, %v666_v14 }
 0x145   : > { %1269 = vmatmul.mubr.msk.f32.gmra.mrb[8].mxu1 %vm742_vm1, %v667_v15 }
 0x146   : > { %1271 = vmatprep.mubr.msk.f32.mxu1 %vm742_vm1, %v668_v16 }
 0x149   : > { %1272 = vmatmul.mubr.msk.f32.gmra.mrb[10].mxu1 %vm742_vm1, %v669_v17 }
 0x208   : > { %v1258_v22 = vpop.f32.mrb[0].mxu1 }
 0x209   : > { %v845_v23 = vpop.f32.mrb[1].mxu1  ;;  %v851_v28 = vadd.f32 %v1258_v22, %v690_v18 }
 0x20a   : > { %v846_v29 = vadd.f32 %v845_v23, %v685_v19 }
 0x20b   : > { %1360 = vtanh.f32 %v851_v28 }
 0x20c   : > { %v1261_v24 = vpop.f32.mrb[2].mxu1  ;;  %1362 = vtanh.f32 %v846_v29 }
 0x20d   : > { %v855_v26 = vpop.f32.mrb[3].mxu1  ;;  %v861_v33 = vadd.f32 %v1261_v24, %v700_v20 }
 0x20e   : > { %v856_v35 = vadd.f32 %v855_v26, %v695_v21 }
 0x20f   : > { %1364 = vtanh.f32 %v861_v33 }
 0x210   : > { %v1264_v30 = vpop.f32.mrb[4].mxu1  ;;  %1366 = vtanh.f32 %v856_v35 }
 0x211   : > { %v865_v31 = vpop.f32.mrb[5].mxu1  ;;  %v871_v43 = vadd.f32 %v1264_v30, %v710_v39 }
 0x212   : > { %v866_v47 = vadd.f32 %v865_v31, %v705_v42 }
 0x214   : > { %v1267_v36 = vpop.f32.mrb[6].mxu1 }
 0x215   : > { %v875_v37 = vpop.f32.mrb[7].mxu1  ;;  %v1361_v46 = vpop.eup %1360  ;;  %v881_v55 = vadd.f32 %v1267_v36, %v720_v52 }
 0x216   : > { %v1363_v50 = vpop.eup %1362  ;;  %v913_v54 = vmul.f32 0.5, %v1361_v46  ;;  %v876_v58 = vadd.f32 %v875_v37, %v715_v53 }
 0x217   : > { %v912_v57 = vmul.f32 0.5, %v1363_v50 }
 0x218   : > { %v1270_v38 = vpop.f32.mrb[8].mxu1  ;;  %v921_v60 = vadd.f32 0.5, %v913_v54  ;;  %v986_v54 = vpop.permute.xlu0 %985 }
 0x219   : > { %v891_v40 = vadd.f32 %v1270_v38, %v730_v25  ;;  %v885_v41 = vpop.f32.mrb[9].mxu1  ;;  %v1365_v56 = vpop.eup %1364  ;;  %v920_v63 = vadd.f32 0.5, %v912_v57 }
 0x21a   : > { %v886_v44 = vadd.f32 %v885_v41, %v725_v27  ;;  %v1367_v59 = vpop.eup %1366  ;;  %v915_v61 = vmul.f32 0.5, %v1365_v56  ;;  %v991_v56 = vpop.permute.xlu1 %990 }
 0x21b   : > { %1368 = vtanh.f32 %v891_v40  ;;  %v914_v0 = vmul.f32 0.5, %v1367_v59 }
 0x21c   : > { %1370 = vtanh.f32 %v886_v44  ;;  %v1273_v45 = vpop.f32.mrb[10].mxu1  ;;  %v923_v5 = vadd.f32 0.5, %v915_v61  ;;  %v996_v59 = vpop.permute.xlu0 %995 }
 0x21d   : > { %v901_v48 = vadd.f32 %v1273_v45, %v740_v32  ;;  %v895_v49 = vpop.f32.mrb[11].mxu1  ;;  %1372 = vtanh.f32 %v871_v43  ;;  %v922_v7 = vadd.f32 0.5, %v914_v0 }
 0x21e   : > { %v896_v51 = vadd.f32 %v895_v49, %v735_v34  ;;  %v1014_v61 = vpop.permute.xlu1 %1013 }
 0x21f   : > { %1374 = vtanh.f32 %v901_v48 }
 0x220   : > { %1376 = vtanh.f32 %v896_v51 }
 0x221   : > { %1378 = vtanh.f32 %v866_v47 }
 0x222   : > { %1380 = vtanh.f32 %v881_v55  ;;  %v1001_v0 = vpop.permute.xlu1 %1000 }
 0x223   : > { %1382 = vtanh.f32 %v876_v58 }
 0x225   : > { %v1369_v62 = vpop.eup %1368 }
 0x226   : > { %v1371_v1 = vpop.eup %1370  ;;  %v933_v2 = vmul.f32 %v1369_v62, %v921_v60 }
 0x227   : > { %v932_v3 = vmul.f32 %v1371_v1, %v920_v63  ;;  %v1373_v4 = vpop.eup %1372  ;;  %v1019_v63 = vpop.permute.xlu0 %1018 }
 0x228   : > { %1384 = vtanh.f32 %v933_v2  ;;  %v917_v12 = vmul.f32 0.5, %v1373_v4 }
 0x229   : > { %v1375_v6 = vpop.eup %1374  ;;  %1386 = vtanh.f32 %v932_v3  ;;  %v1029_v3 = vpop.permute.xlu1 %1028 }
 0x22a   : > { %v1377_v8 = vpop.eup %1376  ;;  %v935_v9 = vmul.f32 %v1375_v6, %v923_v5  ;;  %v925_v16 = vadd.f32 0.5, %v917_v12 }
 0x22b   : > { %v1379_v10 = vpop.eup %1378  ;;  %v934_v11 = vmul.f32 %v1377_v8, %v922_v7  ;;  %v1024_v1 = vpop.permute.xlu0 %1023 }
 0x22c   : > { %1388 = vtanh.f32 %v935_v9  ;;  %v1381_v13 = vpop.eup %1380  ;;  %v916_v14 = vmul.f32 0.5, %v1379_v10 }
 0x22d   : > { %1390 = vtanh.f32 %v934_v11  ;;  %v1383_v15 = vpop.eup %1382  ;;  %v919_v17 = vmul.f32 0.5, %v1381_v13 }
 0x22e   : > { %v924_v19 = vadd.f32 0.5, %v916_v14  ;;  %v918_v20 = vmul.f32 0.5, %v1383_v15 }
 0x22f   : > { %v927_v24 = vadd.f32 0.5, %v919_v17  ;;  %v1046_v12 = vpop.permute.xlu0 %1045  ;;  %v1051_v17 = vpop.permute.xlu1 %1050 }
 0x230   : > { %v926_v26 = vadd.f32 0.5, %v918_v20 }
 0x232   : > { %v1385_v18 = vpop.eup %1384 }
 0x233   : > { %v1387_v21 = vpop.eup %1386  ;;  %v941_v22 = vmul.f32 %v1385_v18, %v925_v16 }
 0x234   : > { %v940_v23 = vmul.f32 %v1387_v21, %v924_v19 }
 0x236   : > { %v1389_v25 = vpop.eup %1388  ;;  %v944_v27 = vadd.f32 %v941_v22, %v940_v23 }
 0x237   : > { %v1391_v28 = vpop.eup %1390  ;;  %v943_v29 = vmul.f32 %v1389_v25, %v927_v24  ;;  %v1056_v24 = vpop.permute.xlu0 %1055 }
 0x238   : > { %v942_v30 = vmul.f32 %v1391_v28, %v926_v26 }
 0x23a   : > { %v945_v31 = vadd.f32 %v944_v27, %v942_v30  ;;  %v1061_v27 = vpop.permute.xlu1 %1060 }
 0x23c   : > { %v946_v32 = vadd.f32 %v945_v31, %v943_v29 }
 0x23e   : > { %v947_v33 = vrot.slane %v946_v32, 4 }
 0x240   : > { %v948_v34 = vadd.f32 %v947_v33, %v946_v32 }
 0x242   : > { %v949_v35 = vrot.slane %v948_v34, 2 }
 0x244   : > { %v950_v36 = vadd.f32 %v949_v35, %v948_v34 }
 0x246   : > { %v951_v37 = vrot.slane %v950_v36, 1 }
 0x248   : > { %v952_v38 = vadd.f32 %v951_v37, %v950_v36 }
 0x24a   : > { %v954_v39 = vmul.f32 0.03125, %v952_v38  ;;  %v1080_v38 = vpop.permute.xlu0 %1079 }
 0x24c   : > { %v957_v40 = vsub.f32 %v942_v30, %v954_v39  ;;  %v955_v41 = vsub.f32 %v940_v23, %v954_v39  ;;  %v956_v42 = vsub.f32 %v941_v22, %v954_v39  ;;  %v958_v43 = vsub.f32 %v943_v29, %v954_v39 }
 0x24d   : > { %v1082_v30 = vlaneseq }
 0x24e   : > { %v959_v44 = vmul.f32 %v955_v41, %v955_v41  ;;  %v960_v45 = vmul.f32 %v956_v42, %v956_v42  ;;  %v961_v46 = vmul.f32 %v957_v40, %v957_v40  ;;  %v962_v48 = vmul.f32 %v958_v43, %v958_v43 }
 0x24f   : > { %v1083_v33 = vshrl.u32 %v1082_v30, 7 }
 0x250   : > { %v963_v47 = vadd.f32 %v960_v45, %v959_v44 }
 0x251   : > { %v1084_v36 = vsub.s32 0, %v1083_v33 }
 0x252   : > { %v964_v49 = vadd.f32 %v963_v47, %v961_v46 }
 0x254   : > { %v965_v50 = vadd.f32 %v964_v49, %v962_v48 }
 0x256   : > { %v966_v51 = vrot.slane %v965_v50, 4 }
 0x258   : > { %v967_v52 = vadd.f32 %v966_v51, %v965_v50 }
 0x25a   : > { %v968_v53 = vrot.slane %v967_v52, 2 }
 0x25c   : > { %v969_v55 = vadd.f32 %v968_v53, %v967_v52 }
 0x25e   : > { %v970_v57 = vrot.slane %v969_v55, 1 }
 0x260   : > { %v971_v58 = vadd.f32 %v970_v57, %v969_v55 }
 0x262   : > { %v972_v60 = vmul.f32 0.03125, %v971_v58 }
 0x264   : > { %v973_v62 = vadd.f32 1e-05, %v972_v60 }
 0x266   : > { %1392 = vrsqrt.f32 %v973_v62 }
 0x270   : > { %v1393_v2 = vpop.eup %1392 }
 0x271   : > { %v975_v4 = vmul.f32 %v1393_v2, %v955_v41  ;;  %v976_v5 = vmul.f32 %v1393_v2, %v956_v42  ;;  %v977_v6 = vmul.f32 %v1393_v2, %v957_v40  ;;  %v978_v7 = vmul.f32 %v1393_v2, %v958_v43 }
 0x272   : > { %v1085_v40 = vrot.slane %v1080_v38, %v1084_v36 }
 0x273   : > { %v1003_v8 = vmul.f32 %v986_v54, %v975_v4  ;;  %v1004_v9 = vmul.f32 %v991_v56, %v976_v5  ;;  %v1005_v10 = vmul.f32 %v996_v59, %v977_v6  ;;  %v1006_v11 = vmul.f32 %v1001_v0, %v978_v7 }
 0x275   : > { %v1031_v13 = vadd.f32 %v1014_v61, %v1003_v8  ;;  %v1032_v14 = vadd.f32 %v1019_v63, %v1004_v9  ;;  %v1033_v15 = vadd.f32 %v1024_v1, %v1005_v10  ;;  %v1034_v16 = vadd.f32 %v1029_v3, %v1006_v11 }
 0x277   : > { %v1035_v18 = vmax.f32 %v1031_v13, 0.0  ;;  %v1036_v19 = vmax.f32 %v1032_v14, 0.0  ;;  %v1037_v20 = vmax.f32 %v1033_v15, 0.0  ;;  %v1038_v21 = vmax.f32 %v1034_v16, 0.0 }
 0x279   : > { %v1063_v22 = vmul.f32 %v1046_v12, %v1035_v18  ;;  %v1064_v23 = vmul.f32 %v1051_v17, %v1036_v19  ;;  %v1065_v25 = vmul.f32 %v1056_v24, %v1037_v20  ;;  %v1066_v28 = vmul.f32 %v1061_v27, %v1038_v21 }
 0x27b   : > { %v1067_v26 = vadd.f32 %v1064_v23, %v1063_v22 }
 0x27d   : > { %v1068_v29 = vadd.f32 %v1067_v26, %v1065_v25 }
 0x27f   : > { %v1069_v31 = vadd.f32 %v1068_v29, %v1066_v28 }
 0x281   : > { %v1070_v32 = vrot.slane %v1069_v31, 4 }
 0x283   : > { %v1071_v34 = vadd.f32 %v1070_v32, %v1069_v31 }
 0x285   : > { %v1072_v35 = vrot.slane %v1071_v34, 2 }
 0x287   : > { %v1073_v37 = vadd.f32 %v1072_v35, %v1071_v34 }
 0x289   : > { %v1074_v39 = vrot.slane %v1073_v37, 1 }
 0x28b   : > { %v1075_v41 = vadd.f32 %v1074_v39, %v1073_v37 }
 0x28d   : > { %v1086_v42 = vadd.f32 %v1085_v40, %v1075_v41 }
 0x28f   : > { %1087 = vst [vmem:[%s369_s17] sm:$0x1] %v1086_v42 }
 0x290   : > { %1407 = shalt.err (!%p1404_p5)
}
 0x291   : > { %s1408_s29 = scalar_lea.hbm %s1783_s24, 16  ;;  %s1412_s15 = scalar_lea.hbm %s1836_s9, 32 }
 0x292   : > { %p1409_p7 = scmp.ne.s32.totalorder %s1783_s24, %s1408_s29  ;;  %p1413_p12 = scmp.lt.u32.totalorder %s1783_s24, %s1836_s9 }
 0x293   : > { %p1414_p13 = scmp.lt.u32.totalorder %s1412_s15, %s1408_s29  ;;  %p1416_p1 = scmp.lt.u32.totalorder %s1408_s29, %s1783_s24 }
 0x294   : > { %p1410_p10 = pnand %p1409_p7, %p1551_p6 }
 0x295   : > { %p1415_p0 = por %p1414_p13, %p1413_p12 }
 0x296   : > { %p1411_p11 = pneg %p1410_p10 }
 0x297   : > { %p1417_p2 = por %p1416_p1, %p1415_p0 }
 0x299   : > { %p1418_p3 = pnand %p1417_p2, %p1411_p11 }
 0x29b   : > { %1421 = shalt.err (!%p1418_p3)
}
 0x29c   : > { %1286 = dma.vmem_to_hbm [thread:$0]  (%p1551_p6), %s1785_s18, 16, %s1783_s24, %s1089_s25  }
 0x29d PF: > { %s1113_s23 = sand.u32 1, %s1444_s11   ;;  %p1289_p4 = pnand %p1164_p9, %p1555_p8 }
 0x29e   : > { %s1114_s26 = scalar_lea.sflag [#allocation5], %s1113_s23 }
 0x29f   : > { %1439 = dma.done.wait (!%p1289_p4), %s1114_s26, 16  }
 0x2a0   : > { %1441 = vsyncadd (!%p1289_p4), %s1114_s26, 4294967280  ;;  %p21_p5 = scmp.ge.s32.totalorder %s1536_s16, 4   ;;  %s1839_s11 = smov %s1448_s12 }
 0x2a1   : > { %s1840_s12 = smov %s1452_s13  ;;  %s1841_s13 = smov %s1549_s19 }
 0x2a2   : > { %s1842_s14 = smov %s1536_s16  ;;  %23 = sbr.rel (!%p21_p5) target bundleno = 6 (0x6), region = 134 }
 0x2a9   :  { %1118 = vsyncpa [#allocation5], 1 }
 0x2aa   :  { %1120 = vsyncpa [#allocation5 + $0x1], 1 }

</bundles_post_ra>
